<compile_context>
chip_gen: v6e
topology: v6e:2x2x1
jax: 0.10.0
libtpu: 0.0.40
codegen_flags: <defaults>
</compile_context>

<pallas_src>
import functools

import jax
import jax.numpy as jnp
from jax.experimental import pallas as pl
from jax.experimental.pallas import tpu as pltpu


def _round_up(n: int, m: int) -> int:
    return ((n + m - 1) // m) * m


def _cdiv(a: int, b: int) -> int:
    return -(-a // b)


def _block_spec(block_shape, index_map, buffers=None):
    """BlockSpec helper: request an explicit buffer count when supported."""
    if buffers is None:
        return pl.BlockSpec(block_shape, index_map)
    try:
        return pl.BlockSpec(block_shape, index_map,
                            pipeline_mode=pl.Buffered(buffers))
    except (TypeError, AttributeError):
        # Older JAX without pipeline_mode/Buffered: fall back to default (2).
        return pl.BlockSpec(block_shape, index_map)


def mlp_kernel(x_ref, w1_ref, b1_ref, w2_ref, b2_ref, o_ref):
    # Hidden layer: bf16 x bf16 matmul on the MXU, f32 accumulation.
    h = jnp.dot(x_ref[...], w1_ref[...], preferred_element_type=jnp.float32)
    # Bias add + ReLU in f32 on the VPU.
    h = jnp.maximum(h + b1_ref[...], 0.0)
    # Output layer: cast activations to bf16 right before the second MXU pass.
    y = jnp.dot(h.astype(w2_ref.dtype), w2_ref[...],
                preferred_element_type=jnp.float32)
    o_ref[...] = (y + b2_ref[...]).astype(o_ref.dtype)


def prepare_mlp_params(w1, b1, w2, b2, compute_dtype=jnp.bfloat16):
    """One-time parameter prep (call at init, reuse across forward calls).

    Pads feature dims to the 128-lane width and casts weights to the MXU input
    dtype ONCE, so every forward pass does not re-read/re-write both weight
    matrices through HBM. Weights are stored pre-transposed as [in, out]:
    y = relu(x @ W1 + b1) @ W2 + b2.
    """
    K, H = w1.shape
    Hw, N = w2.shape
    assert Hw == H
    k_pad, h_pad, n_pad = (_round_up(d, 128) for d in (K, H, N))
    w1p = jnp.pad(jnp.asarray(w1, compute_dtype),
                  ((0, k_pad - K), (0, h_pad - H)))
    w2p = jnp.pad(jnp.asarray(w2, compute_dtype),
                  ((0, h_pad - H), (0, n_pad - N)))
    b1p = jnp.pad(jnp.asarray(b1, jnp.float32).reshape(1, H),
                  ((0, 0), (0, h_pad - H)))
    b2p = jnp.pad(jnp.asarray(b2, jnp.float32).reshape(1, N),
                  ((0, 0), (0, n_pad - N)))
    return (w1p, b1p, w2p, b2p), (K, H, N)


# Conservative per-core VMEM budget that fits v5e/v6e (128 MiB) and v7x (64 MiB,
# 32 MiB default scoped, one weight copy per TensorCore when megacore-sharded).
_VMEM_BUDGET = 24 << 20


def _plan_tiles(B, k_pad, h_pad, n_pad, max_tile_b, out_bytes):
    """Pick balanced batch tiles (multiples of 16) and an N-chunk for W2 so the
    kernel's VMEM footprint stays under budget on all generations."""
    nb = max(1, _cdiv(B, max_tile_b))
    # v7x megacore: ensure >= 2 batch steps when there is enough batch to split.
    if nb == 1 and B >= 256:
        nb = 2
    tile_b = _round_up(_cdiv(B, nb), 16)
    tile_n = n_pad

    def footprint(tb, tn):
        nn = _cdiv(n_pad, tn)
        w2_bufs = 1 if nn == 1 else 2          # resident vs streamed W2 chunks
        return (2 * tb * k_pad * 2                        # x tile, bf16, 2 bufs
                + (k_pad * h_pad * 2 + h_pad * 4)         # W1 + b1, single buf
                + w2_bufs * (h_pad * tn * 2 + tn * 4)     # W2 + b2 chunk
                + 2 * tb * tn * out_bytes)                # out tile, 2 bufs

    # If the fully-resident layout overflows the budget, stream W2 in N-chunks.
    while footprint(tile_b, tile_n) > _VMEM_BUDGET and tile_n > 128:
        tile_n = max(128, _round_up(tile_n // 2, 128))
    # Then shrink the batch tile.
    while footprint(tile_b, tile_n) > _VMEM_BUDGET and tile_b > 16:
        tile_b = max(16, _round_up(tile_b // 2, 16))
    # TODO(synk): for very large H where W1 alone exceeds the budget, stream W1
    # in H-chunks along an 'arbitrary' grid axis with an f32 VMEM accumulator
    # (pl.when init/finalize).
    return tile_b, tile_n, footprint(tile_b, tile_n)


@functools.partial(jax.jit,
                   static_argnames=("dims", "out_dtype", "max_tile_b"))
def mlp_forward(x, w1p, b1p, w2p, b2p, *, dims, out_dtype=jnp.float32,
                max_tile_b=512):
    """x: [B, K]; padded params from prepare_mlp_params; returns [B, N]."""
    K, H, N = dims
    B = x.shape[0]
    assert x.shape[1] == K
    k_pad, h_pad = w1p.shape
    n_pad = w2p.shape[1]
    compute_dtype = w1p.dtype
    out_bytes = jnp.dtype(out_dtype).itemsize

    tile_b, tile_n, fp = _plan_tiles(B, k_pad, h_pad, n_pad, max_tile_b,
                                     out_bytes)
    nb = _cdiv(B, tile_b)
    nn = _cdiv(n_pad, tile_n)
    b_pad = nb * tile_b

    # Fused pad+cast of the activations (single pass over x).
    xp = jnp.pad(x.astype(compute_dtype), ((0, b_pad - B), (0, k_pad - K)))

    flops = 2 * b_pad * k_pad * h_pad * nn + 2 * b_pad * h_pad * n_pad
    bytes_accessed = (xp.size * 2 + w1p.size * 2 + w2p.size * 2
                      + b1p.size * 4 + b2p.size * 4
                      + b_pad * n_pad * out_bytes)

    # Constant-index (resident) inputs: single buffer. Streamed W2 chunks
    # (nn > 1): keep default double-buffering for pipelining.
    w2_bufs = 1 if nn == 1 else None

    grid_spec = pl.GridSpec(
        grid=(nb, nn),
        in_specs=[
            _block_spec((tile_b, k_pad), lambda i, j: (i, 0)),
            _block_spec((k_pad, h_pad), lambda i, j: (0, 0), buffers=1),
            _block_spec((1, h_pad), lambda i, j: (0, 0), buffers=1),
            _block_spec((h_pad, tile_n), lambda i, j: (0, j), buffers=w2_bufs),
            _block_spec((1, tile_n), lambda i, j: (0, j), buffers=w2_bufs),
        ],
        out_specs=pl.BlockSpec((tile_b, tile_n), lambda i, j: (i, j)),
    )

    # Explicit scoped-VMEM budget from the real footprint (+ headroom for
    # Mosaic internal scratch), floored at 16 MiB so tiny kernels never regress.
    vmem_limit = max(int(fp) + (4 << 20), 16 << 20)
    vmem_limit = min(_round_up(vmem_limit, 1 << 20), 100 << 20)

    out = pl.pallas_call(
        mlp_kernel,
        out_shape=jax.ShapeDtypeStruct((b_pad, n_pad), out_dtype),
        grid_spec=grid_spec,
        compiler_params=pltpu.CompilerParams(
            dimension_semantics=("parallel", "parallel"),
            vmem_limit_bytes=vmem_limit),
        cost_estimate=pl.CostEstimate(
            flops=flops, transcendentals=0, bytes_accessed=bytes_accessed),
    )(xp, w1p, b1p, w2p, b2p)

    return out[:B, :N]


def init_linear_params(key, fan_in, fan_out, dtype=jnp.float32):
    """Mirrors torch.nn.Linear default init: U(-1/sqrt(fan_in), 1/sqrt(fan_in)).
    Weight returned as [fan_in, fan_out] (pre-transposed)."""
    kw, kb = jax.random.split(key)
    bound = 1.0 / jnp.sqrt(jnp.asarray(fan_in, dtype))
    w = jax.random.uniform(kw, (fan_in, fan_out), dtype, -bound, bound)
    b = jax.random.uniform(kb, (1, fan_out), dtype, -bound, bound)
    return w, b


if __name__ == "__main__":
    # Small shapes consistent with MLP(num_inputs, num_hidden, num_outputs).
    batch, num_inputs, num_hidden, num_outputs = 8, 32, 64, 16

    root = jax.random.PRNGKey(0)
    kx, k1, k2 = jax.random.split(root, 3)

    x = jax.random.normal(kx, (batch, num_inputs), jnp.float32)
    w1, b1 = init_linear_params(k1, num_inputs, num_hidden)
    w2, b2 = init_linear_params(k2, num_hidden, num_outputs)

    # One-time parameter prep (padding + bf16 cast) -- hoisted out of forward.
    (w1p, b1p, w2p, b2p), dims = prepare_mlp_params(w1, b1, w2, b2)

    y = mlp_forward(x, w1p, b1p, w2p, b2p, dims=dims)
    y = jax.block_until_ready(y)
    assert y.shape == (batch, num_outputs)
    assert y.dtype == jnp.float32

    # Reference with the same bf16 input quantization / f32 accumulation as the
    # kernel (fair, tight comparison).
    xq = x.astype(jnp.bfloat16).astype(jnp.float32)
    w1q = w1.astype(jnp.bfloat16).astype(jnp.float32)
    w2q = w2.astype(jnp.bfloat16).astype(jnp.float32)
    h_ref = jnp.maximum(xq @ w1q + b1, 0.0)
    y_ref = h_ref.astype(jnp.bfloat16).astype(jnp.float32) @ w2q + b2
    assert jnp.allclose(y, y_ref, atol=1e-3, rtol=1e-3), (
        float(jnp.max(jnp.abs(y - y_ref))))

    print("KERNEL_OK")
</pallas_src>

<mosaic_0001>
module attributes {stable_mosaic.version = 11 : i64} {
  func.func @mlp_kernel(%arg0: i32, %arg1: i32, %arg2: memref<16x128xbf16, #tpu.memory_space<vmem>>, %arg3: memref<128x128xbf16, #tpu.memory_space<vmem>>, %arg4: memref<1x128xf32, #tpu.memory_space<vmem>>, %arg5: memref<128x128xbf16, #tpu.memory_space<vmem>>, %arg6: memref<1x128xf32, #tpu.memory_space<vmem>>, %arg7: memref<16x128xf32, #tpu.memory_space<vmem>>) attributes {dimension_semantics = [#tpu.dimension_semantics<parallel>, #tpu.dimension_semantics<parallel>], iteration_bounds = array<i64: 1, 1>, scalar_prefetch = 0 : i64, scratch_operands = 0 : i64, tpu.core_type = #tpu.core_type<tc>, window_params = [{transform_indices = @transform_0, window_bounds = array<i64: 16, 128>}, {pipeline_mode = #tpu.pipeline_mode<synchronous>, transform_indices = @transform_1, window_bounds = array<i64: 128, 128>}, {pipeline_mode = #tpu.pipeline_mode<synchronous>, transform_indices = @transform_2, window_bounds = array<i64: 1, 128>}, {pipeline_mode = #tpu.pipeline_mode<synchronous>, transform_indices = @transform_3, window_bounds = array<i64: 128, 128>}, {pipeline_mode = #tpu.pipeline_mode<synchronous>, transform_indices = @transform_4, window_bounds = array<i64: 1, 128>}, {transform_indices = @transform_5, window_bounds = array<i64: 16, 128>}]} {
    %c0 = arith.constant 0 : index
    %c0_0 = arith.constant 0 : index
    %0 = vector.load %arg2[%c0, %c0_0] : memref<16x128xbf16, #tpu.memory_space<vmem>>, vector<16x128xbf16>
    %c0_1 = arith.constant 0 : index
    %c0_2 = arith.constant 0 : index
    %1 = vector.load %arg3[%c0_1, %c0_2] : memref<128x128xbf16, #tpu.memory_space<vmem>>, vector<128x128xbf16>
    %cst = arith.constant dense<0.000000e+00> : vector<16x128xf32>
    %2 = tpu.matmul %0, %1, %cst {dimension_numbers = #tpu.dot_dimension_numbers<[1], [0], [0], [1], [0, 0, 1, 1], [], []>} : vector<16x128xbf16>, vector<128x128xbf16>, vector<16x128xf32> -> vector<16x128xf32>
    %c0_3 = arith.constant 0 : index
    %c0_4 = arith.constant 0 : index
    %3 = vector.load %arg4[%c0_3, %c0_4] : memref<1x128xf32, #tpu.memory_space<vmem>>, vector<1x128xf32>
    %4 = vector.broadcast %3 : vector<1x128xf32> to vector<16x128xf32>
    %5 = arith.addf %2, %4 : vector<16x128xf32>
    %cst_5 = arith.constant 0.000000e+00 : f32
    %6 = vector.broadcast %cst_5 : f32 to vector<16x128xf32>
    %7 = arith.maximumf %5, %6 : vector<16x128xf32>
    %8 = arith.truncf %7 : vector<16x128xf32> to vector<16x128xbf16>
    %c0_6 = arith.constant 0 : index
    %c0_7 = arith.constant 0 : index
    %9 = vector.load %arg5[%c0_6, %c0_7] : memref<128x128xbf16, #tpu.memory_space<vmem>>, vector<128x128xbf16>
    %cst_8 = arith.constant dense<0.000000e+00> : vector<16x128xf32>
    %10 = tpu.matmul %8, %9, %cst_8 {dimension_numbers = #tpu.dot_dimension_numbers<[1], [0], [0], [1], [0, 0, 1, 1], [], []>} : vector<16x128xbf16>, vector<128x128xbf16>, vector<16x128xf32> -> vector<16x128xf32>
    %c0_9 = arith.constant 0 : index
    %c0_10 = arith.constant 0 : index
    %11 = vector.load %arg6[%c0_9, %c0_10] : memref<1x128xf32, #tpu.memory_space<vmem>>, vector<1x128xf32>
    %12 = vector.broadcast %11 : vector<1x128xf32> to vector<16x128xf32>
    %13 = arith.addf %10, %12 : vector<16x128xf32>
    %c0_11 = arith.constant 0 : index
    %c0_12 = arith.constant 0 : index
    %14 = vector.load %arg7[%c0_11, %c0_12] : memref<16x128xf32, #tpu.memory_space<vmem>>, vector<16x128xf32>
    tpu.vector_store %arg7[%c0_11, %c0_12], %13 {strides = array<i32>} : memref<16x128xf32, #tpu.memory_space<vmem>>, vector<16x128xf32>,
    return
  }
  func.func @transform_0(%arg0: i32, %arg1: i32) -> (i32, i32) {
    %c0_i32 = arith.constant 0 : i32
    %c0_i32_0 = arith.constant 0 : i32
    return %arg0, %c0_i32 : i32, i32
  }
  func.func @transform_1(%arg0: i32, %arg1: i32) -> (i32, i32) {
    %c0_i32 = arith.constant 0 : i32
    %c0_i32_0 = arith.constant 0 : i32
    %c0_i32_1 = arith.constant 0 : i32
    return %c0_i32, %c0_i32_0 : i32, i32
  }
  func.func @transform_2(%arg0: i32, %arg1: i32) -> (i32, i32) {
    %c0_i32 = arith.constant 0 : i32
    %c0_i32_0 = arith.constant 0 : i32
    %c0_i32_1 = arith.constant 0 : i32
    return %c0_i32, %c0_i32_0 : i32, i32
  }
  func.func @transform_3(%arg0: i32, %arg1: i32) -> (i32, i32) {
    %c0_i32 = arith.constant 0 : i32
    %c0_i32_0 = arith.constant 0 : i32
    return %c0_i32, %arg1 : i32, i32
  }
  func.func @transform_4(%arg0: i32, %arg1: i32) -> (i32, i32) {
    %c0_i32 = arith.constant 0 : i32
    %c0_i32_0 = arith.constant 0 : i32
    return %c0_i32, %arg1 : i32, i32
  }
  func.func @transform_5(%arg0: i32, %arg1: i32) -> (i32, i32) {
    %c0_i32 = arith.constant 0 : i32
    return %arg0, %arg1 : i32, i32
  }
}

</mosaic_0001>

<bundles_post_ra>
// kernel: mlp_forward.1
= control target key start
LH: loop header
LB: loop body
LE: loop exit
PB: predicated region body
PF: predicated region fallthrough
CT: control target
= control target key end

     0   :  { %10 = vsyncpa [#allocation3], 0  ;;  %s493_s0 = inlined_call_operand.vmem [shape: bf16[16,128], index: 0, kind: input, shape index: {}]   ;;  %s494_s1 = inlined_call_operand.hbm [shape: bf16[128,128], index: 1, kind: input, shape index: {}]   ;;  %s495_s2 = inlined_call_operand.vmem [shape: f32[1,128], index: 2, kind: input, shape index: {}]   ;;  %s496_s3 = inlined_call_operand.hbm [shape: bf16[128,128], index: 3, kind: input, shape index: {}]   ;;  %s497_s4 = inlined_call_operand.vmem [shape: f32[1,128], index: 4, kind: input, shape index: {}]   ;;  %s498_s5 = inlined_call_operand.vmem [shape: f32[16,128], index: 5, kind: output, shape index: {}]  }
   0x1   :  { %11 = vsyncpa [#allocation5], 0  ;;  %s436_s18 = smov [#allocation2]  }
   0x2   :  { %s19_s19 = sshll.u32 %s436_s18, 4  ;;  %s20_s19 = int_to_ptr.vmem [resolvable:$true] %s19_s19 }
   0x3   :  { %s400_s20 = scalar_lea.vmem %s20_s19, 1024  ;;  %p405_p1 = scmp.lt.s32.totalorder %s20_s19, %s20_s19 }
   0x4   :  { %p401_p0 = scmp.ne.s32.totalorder %s20_s19, %s400_s20  ;;  %p406_p2 = scmp.lt.s32.totalorder %s400_s20, %s400_s20 }
   0x6   :  { %p407_p3 = por %p406_p2, %p405_p1 }
   0x8   :  { %p408_p4 = pnand %p407_p3, %p401_p0 }
   0xa   :  { %411 = shalt.err (!%p408_p4)
}
   0xb   :  { %s437_s21 = smov 64   ;;  %s438_s22 = smov 4  }
   0xc   :  { %25 = dma.hbm_to_vmem [thread:$0]  %s494_s1, 1024, %s20_s19, [#allocation3], %s437_s21, %s437_s21, %s438_s22  }
   0xd   :  { %s439_s25 = smov [#allocation4]  }
   0xe   :  { %s33_s26 = sshll.u32 %s439_s25, 4  ;;  %s34_s26 = int_to_ptr.vmem [resolvable:$true] %s33_s26 }
   0xf   :  { %s420_s27 = scalar_lea.vmem %s34_s26, 1024  ;;  %p425_p6 = scmp.lt.s32.totalorder %s34_s26, %s34_s26 }
  0x10   :  { %p421_p5 = scmp.ne.s32.totalorder %s34_s26, %s420_s27  ;;  %p426_p7 = scmp.lt.s32.totalorder %s420_s27, %s420_s27 }
  0x12   :  { %p427_p8 = por %p426_p7, %p425_p6 }
  0x14   :  { %p428_p9 = pnand %p427_p8, %p421_p5 }
  0x16   :  { %431 = shalt.err (!%p428_p9)
}
  0x17   :  { %39 = dma.hbm_to_vmem [thread:$0]  %s496_s3, 1024, %s34_s26, [#allocation5], %s437_s21, %s437_s21, %s438_s22  }
  0x18   :  { %432 = dma.done.wait [#allocation3], 1024  }
  0x19   :  { %433 = vsyncadd [#allocation3], 4294966272 }
  0x1a   :  { %434 = dma.done.wait [#allocation5], 1024  }
  0x1b   :  { %435 = vsyncadd [#allocation5], 4294966272  ;;  %v440_v0 = vmov 0.0   ;;  %vm441_vm0 = vmmov 0   ;;  %v375_v1 = vld [vmem:[#allocation2 + $0x38] sm:$0xff]   ;;  %v376_v2 = vld [vmem:[#allocation2 + $0x30] sm:$0xff]  }
  0x1c   :  { %329 = vmatprep.subr.bf16.mxu0 %v440_v0  ;;  %345 = vmatprep.mubr.msk.bf16.mxu0 %vm441_vm0, %v440_v0  ;;  %v377_v3 = vld [vmem:[#allocation2 + $0x28] sm:$0xff]   ;;  %v384_v4 = vld [vmem:[#allocation4 + $0x38] sm:$0xff]   ;;  %v378_v5 = vld [vmem:[#allocation2 + $0x20] sm:$0xff]  }
  0x1d   :  { %349 = vmatprep.subr.bf16.mxu1 %v440_v0  ;;  %365 = vmatprep.mubr.msk.bf16.mxu1 %vm441_vm0, %v440_v0  ;;  %v385_v6 = vld [vmem:[#allocation4 + $0x30] sm:$0xff]   ;;  %v379_v7 = vld [vmem:[#allocation2 + $0x18] sm:$0xff]   ;;  %v386_v8 = vld [vmem:[#allocation4 + $0x28] sm:$0xff]  }
  0x1e   :  { %330 = vmatpush3.bf16.msra.mxu0 %v375_v1  ;;  %350 = vmatpush3.bf16.msra.mxu1 %v384_v4  ;;  %v380_v9 = vld [vmem:[#allocation2 + $0x10] sm:$0xff]   ;;  %v387_v10 = vld [vmem:[#allocation4 + $0x20] sm:$0xff]   ;;  %v381_v11 = vld [vmem:[#allocation2 + $0x8] sm:$0xff]  }
  0x1f   :  { %331 = vmatprep.subr.bf16.mxu0 %v440_v0  ;;  %351 = vmatprep.subr.bf16.mxu1 %v440_v0  ;;  %v388_v12 = vld [vmem:[#allocation4 + $0x18] sm:$0xff]   ;;  %v382_v13 = vld [vmem:[#allocation2] sm:$0xff]   ;;  %v389_v15 = vld [vmem:[#allocation4 + $0x10] sm:$0xff]  }
  0x20   :  { %v383_v14 = vld [vmem:[%s493_s0] sm:$0xff]   ;;  %v390_v16 = vld [vmem:[#allocation4 + $0x8] sm:$0xff]  }
  0x21   :  { %v391_v17 = vld [vmem:[#allocation4] sm:$0xff]  }
  0x22   :  { %332 = vmatpush3.bf16.msra.mxu0 %v376_v2  ;;  %352 = vmatpush3.bf16.msra.mxu1 %v385_v6  ;;  %v292_v18 = vld [vmem:[%s495_s2] ss:$0 sm:$0xff] }
  0x23   :  { %333 = vmatprep.subr.bf16.mxu0 %v440_v0  ;;  %353 = vmatprep.subr.bf16.mxu1 %v440_v0  ;;  %v302_v28 = vld [vmem:[%s497_s4] ss:$0 sm:$0xff] }
  0x26   :  { %334 = vmatpush3.bf16.msra.mxu0 %v377_v3  ;;  %354 = vmatpush3.bf16.msra.mxu1 %v386_v8 }
  0x27   :  { %335 = vmatprep.subr.bf16.mxu0 %v440_v0  ;;  %355 = vmatprep.subr.bf16.mxu1 %v440_v0 }
  0x2a   :  { %336 = vmatpush3.bf16.msra.mxu0 %v378_v5  ;;  %356 = vmatpush3.bf16.msra.mxu1 %v387_v10 }
  0x2b   :  { %337 = vmatprep.subr.bf16.mxu0 %v440_v0  ;;  %357 = vmatprep.subr.bf16.mxu1 %v440_v0 }
  0x2e   :  { %338 = vmatpush3.bf16.msra.mxu0 %v379_v7  ;;  %358 = vmatpush3.bf16.msra.mxu1 %v388_v12 }
  0x2f   :  { %339 = vmatprep.subr.bf16.mxu0 %v440_v0  ;;  %359 = vmatprep.subr.bf16.mxu1 %v440_v0 }
  0x32   :  { %340 = vmatpush3.bf16.msra.mxu0 %v380_v9  ;;  %360 = vmatpush3.bf16.msra.mxu1 %v389_v15 }
  0x33   :  { %341 = vmatprep.subr.bf16.mxu0 %v440_v0  ;;  %361 = vmatprep.subr.bf16.mxu1 %v440_v0 }
  0x36   :  { %342 = vmatpush3.bf16.msra.mxu0 %v381_v11  ;;  %362 = vmatpush3.bf16.msra.mxu1 %v390_v16 }
  0x37   :  { %343 = vmatprep.subr.bf16.mxu0 %v440_v0  ;;  %363 = vmatprep.subr.bf16.mxu1 %v440_v0 }
  0x3a   :  { %344 = vmatpush3.bf16.msra.mxu0 %v382_v13  ;;  %364 = vmatpush3.bf16.msra.mxu1 %v391_v17 }
  0x3d   :  { %346 = vmatmul.mubr.bf16.vlgmr.msra.gmra.mxu0 %v383_v14 }
  0xfd   :  { %v162_v19 = vpop.f32.mrf.mxu0 }
  0xfe   :  { %v163_v21 = vadd.f32 %v292_v18, %v162_v19 }
  0xff   :  { %v347_v20 = vpop.f32.mrf.mxu0 }
 0x100   :  { %v169_v25 = vmax.f32 %v163_v21, 0.0 }
 0x101   :  { %v165_v22 = vpop.f32.mrf.mxu0 }
 0x102   :  { %v166_v23 = vadd.f32 %v292_v18, %v165_v22 }
 0x103   :  { %v348_v24 = vpop.f32.mrf.mxu0 }
 0x104   :  { %v170_v26 = vmax.f32 %v166_v23, 0.0 }
 0x106   :  { %v171_v27 = vpack.c.bf16 %v170_v26, %v169_v25 }
 0x108   :  { %366 = vmatmul.mubr.bf16.vlgmr.msra.gmra.mxu1 %v171_v27 }
 0x1c8   :  { %v277_v29 = vpop.f32.mrf.mxu1 }
 0x1c9   :  { %v278_v30 = vadd.f32 %v302_v28, %v277_v29 }
 0x1ca   :  { %v367_v31 = vpop.f32.mrf.mxu1 }
 0x1cb   :  { %284 = vst [vmem:[%s498_s5] sm:$0xff] %v278_v30 }
 0x1cc   :  { %v280_v32 = vpop.f32.mrf.mxu1 }
 0x1cd   :  { %v281_v33 = vadd.f32 %v302_v28, %v280_v32 }
 0x1ce   :  { %v368_v34 = vpop.f32.mrf.mxu1 }
 0x1cf   :  { %285 = vst [vmem:[%s498_s5 + $0x8] sm:$0xff] %v281_v33 }
 0x1d0   :  { %290 = vsyncpa [#allocation3], 1 }
 0x1d1   :  { %291 = vsyncpa [#allocation5], 1 }

</bundles_post_ra>
